<compile_context>
chip_gen: v7x
topology: tpu7x:2x2x1
jax: 0.10.0
libtpu: 0.0.40
codegen_flags: <defaults>
</compile_context>

<pallas_src>
import functools

import jax
import jax.numpy as jnp
from jax.experimental import pallas as pl
from jax.experimental.pallas import tpu as pltpu

_LANE = 128


def _round_up(x, m):
    return ((x + m - 1) // m) * m


def _make_mlp_kernel(n_hidden_layers: int, activation_type: str):
    """Builds a fused-MLP Pallas kernel body for a fixed layer count."""

    def kernel(*refs):
        x_ref = refs[0]
        out_ref = refs[-1]
        param_refs = refs[1:-1]  # (w1, b1, w2, b2, ..., w_out, b_out)

        h = x_ref[...].astype(jnp.float32)  # mirrors x.float() in forward()
        for i in range(n_hidden_layers):
            w = param_refs[2 * i][...]          # bf16 (in, out)
            b = param_refs[2 * i + 1][...]      # f32  (1, out)
            # bf16 MXU matmul, f32 accumulation; bias + activation stay in f32.
            h = jnp.dot(h.astype(jnp.bfloat16), w,
                        preferred_element_type=jnp.float32) + b
            if activation_type == "relu":
                h = jnp.maximum(h, 0.0)
            else:
                h = jnp.tanh(h)
            # nn.Dropout(0.5) -> identity at inference time.
        w_out = param_refs[-2][...]
        b_out = param_refs[-1][...]
        out_ref[...] = jnp.dot(h.astype(jnp.bfloat16), w_out,
                               preferred_element_type=jnp.float32) + b_out

    return kernel


@functools.partial(jax.jit, static_argnames=("activation_type", "tile_m"))
def feedforward_pallas(x, params, activation_type="relu", tile_m=None):
    """x: (B, n_features) f32.  params: list of (W(in,out) f32, b(1,out) f32) pairs."""
    B, F = x.shape
    n_classes = params[-1][0].shape[1]
    n_hidden_layers = len(params) - 1

    # ---- Host-side layout prep: pad K/N of every layer to 128 lanes, cast W to bf16.
    padded_params = []
    for (w, b) in params:
        kin, kout = w.shape
        kin_p, kout_p = _round_up(kin, _LANE), _round_up(kout, _LANE)
        w_p = jnp.zeros((kin_p, kout_p), jnp.bfloat16)
        w_p = w_p.at[:kin, :kout].set(w.astype(jnp.bfloat16))
        b_p = jnp.zeros((1, kout_p), jnp.float32)
        b_p = b_p.at[:, :kout].set(b.astype(jnp.float32))
        padded_params.append((w_p, b_p))
    F_p = _round_up(F, _LANE)
    N_p = padded_params[-1][0].shape[1]

    # ---- Batch tiling: multiple grid steps -> pipelining + v7x dual-TC sharding.
    if tile_m is None:
        tile_m = min(512, _round_up(B, 8))
    tile_m = max(8, _round_up(tile_m, 8))
    grid_m = pl.cdiv(B, tile_m)
    B_p = grid_m * tile_m

    x_p = jnp.zeros((B_p, F_p), jnp.float32)
    x_p = x_p.at[:B, :F].set(x.astype(jnp.float32))

    kernel = _make_mlp_kernel(n_hidden_layers, activation_type)

    # x tiled over the batch axis; all (padded, bf16) weights/biases resident full-block.
    in_specs = [pl.BlockSpec((tile_m, F_p), lambda i: (i, 0))]
    flat_params = []
    for (w, b) in padded_params:
        in_specs.append(pl.BlockSpec(w.shape, lambda i: (0, 0)))
        in_specs.append(pl.BlockSpec(b.shape, lambda i: (0, 0)))
        flat_params.extend([w, b])
    out_spec = pl.BlockSpec((tile_m, N_p), lambda i: (i, 0))

    # ---- VMEM budget: resident params + double-buffered in/out tiles (+ slack).
    param_bytes = sum(w.size * w.dtype.itemsize + b.size * b.dtype.itemsize
                      for (w, b) in padded_params)
    tile_bytes = tile_m * (F_p + N_p) * 4
    vmem_bytes = int(min(max(2 * (param_bytes + tile_bytes) + (4 << 20), 32 << 20),
                         64 << 20))

    # ---- Advisory cost estimate for XLA's scheduler.
    flops = 2 * B_p * sum(w.shape[0] * w.shape[1] for (w, _) in padded_params)
    transcendentals = 0
    if activation_type != "relu" and n_hidden_layers > 0:
        transcendentals = B_p * sum(w.shape[1] for (w, _) in padded_params[:-1])
    bytes_accessed = B_p * F_p * 4 + param_bytes + B_p * N_p * 4

    out_p = pl.pallas_call(
        kernel,
        out_shape=jax.ShapeDtypeStruct((B_p, N_p), jnp.float32),
        grid_spec=pltpu.PrefetchScalarGridSpec(
            num_scalar_prefetch=0,
            grid=(grid_m,),
            in_specs=in_specs,
            out_specs=out_spec,
        ),
        compiler_params=pltpu.CompilerParams(
            dimension_semantics=("parallel",),
            vmem_limit_bytes=vmem_bytes,
        ),
        cost_estimate=pl.CostEstimate(
            flops=flops,
            transcendentals=transcendentals,
            bytes_accessed=bytes_accessed,
        ),
    )(x_p, *flat_params)

    # Drop batch padding and lane padding of the logits.
    return out_p[:B, :n_classes]


def init_params(key, n_features, hidden_size, n_classes, layers):
    """Deterministic synthetic init. Weights stored as (in, out)."""
    params = []
    keys = jax.random.split(key, 2 * (layers + 1))
    k_idx = 0
    for i in range(layers):
        fan_in = n_features if i == 0 else hidden_size
        w = jax.random.normal(keys[k_idx], (fan_in, hidden_size), jnp.float32) * (1.0 / jnp.sqrt(fan_in))
        b = jax.random.normal(keys[k_idx + 1], (1, hidden_size), jnp.float32) * 0.01
        params.append((w, b))
        k_idx += 2
    fan_in = hidden_size if layers > 0 else n_features
    w = jax.random.normal(keys[k_idx], (fan_in, n_classes), jnp.float32) * (1.0 / jnp.sqrt(fan_in))
    b = jax.random.normal(keys[k_idx + 1], (1, n_classes), jnp.float32) * 0.01
    params.append((w, b))
    return params


def feedforward_ref_f32(x, params, activation_type="relu"):
    """Pure f32 reference (PyTorch eval-mode semantics)."""
    h = x.astype(jnp.float32)
    for (w, b) in params[:-1]:
        h = h @ w + b
        h = jnp.maximum(h, 0.0) if activation_type == "relu" else jnp.tanh(h)
    w, b = params[-1]
    return h @ w + b


def feedforward_ref_bf16(x, params, activation_type="relu"):
    """Reference matching the kernel's numerics (bf16 matmul operands, f32 accumulate)."""
    h = x.astype(jnp.float32)
    for (w, b) in params[:-1]:
        h = jnp.dot(h.astype(jnp.bfloat16), w.astype(jnp.bfloat16),
                    preferred_element_type=jnp.float32) + b
        h = jnp.maximum(h, 0.0) if activation_type == "relu" else jnp.tanh(h)
    w, b = params[-1]
    return jnp.dot(h.astype(jnp.bfloat16), w.astype(jnp.bfloat16),
                   preferred_element_type=jnp.float32) + b


if __name__ == "__main__":
    # Small shapes implied by the module: (batch, n_features) -> (batch, n_classes)
    batch = 8
    n_features = 16
    hidden_size = 32
    n_classes = 4
    layers = 2

    key = jax.random.PRNGKey(0)
    kx, kp, kx2 = jax.random.split(key, 3)
    x = jax.random.normal(kx, (batch, n_features), jnp.float32)
    params = init_params(kp, n_features, hidden_size, n_classes, layers)

    # 1) ReLU, small batch (single grid step).
    out = jax.block_until_ready(feedforward_pallas(x, params, "relu"))
    assert out.shape == (batch, n_classes)
    assert jnp.allclose(out, feedforward_ref_bf16(x, params, "relu"), atol=1e-3, rtol=1e-3)
    assert jnp.allclose(out, feedforward_ref_f32(x, params, "relu"), atol=5e-2, rtol=5e-2)

    # 2) Tanh path.
    out_t = jax.block_until_ready(feedforward_pallas(x, params, "tanh"))
    assert out_t.shape == (batch, n_classes)
    assert jnp.allclose(out_t, feedforward_ref_f32(x, params, "tanh"), atol=5e-2, rtol=5e-2)

    # 3) Non-divisible batch + multi-step grid (exercises cdiv/pad path and pipelining).
    batch2 = 300
    x2 = jax.random.normal(kx2, (batch2, n_features), jnp.float32)
    out2 = jax.block_until_ready(feedforward_pallas(x2, params, "relu", tile_m=128))
    assert out2.shape == (batch2, n_classes)
    assert jnp.allclose(out2, feedforward_ref_bf16(x2, params, "relu"), atol=1e-3, rtol=1e-3)

    print("KERNEL_OK")
</pallas_src>

<mosaic_0001>
module attributes {stable_mosaic.version = 11 : i64} {
  func.func @kernel(%arg0: i32, %arg1: memref<8x128xf32, #tpu.memory_space<vmem>>, %arg2: memref<128x128xbf16, #tpu.memory_space<vmem>>, %arg3: memref<1x128xf32, #tpu.memory_space<vmem>>, %arg4: memref<128x128xbf16, #tpu.memory_space<vmem>>, %arg5: memref<1x128xf32, #tpu.memory_space<vmem>>, %arg6: memref<128x128xbf16, #tpu.memory_space<vmem>>, %arg7: memref<1x128xf32, #tpu.memory_space<vmem>>, %arg8: memref<8x128xf32, #tpu.memory_space<vmem>>) attributes {dimension_semantics = [#tpu.dimension_semantics<parallel>], iteration_bounds = array<i64: 1>, scalar_prefetch = 0 : i64, scratch_operands = 0 : i64, tpu.core_type = #tpu.core_type<tc>, window_params = [{transform_indices = @transform_0, window_bounds = array<i64: 8, 128>}, {pipeline_mode = #tpu.pipeline_mode<synchronous>, transform_indices = @transform_1, window_bounds = array<i64: 128, 128>}, {pipeline_mode = #tpu.pipeline_mode<synchronous>, transform_indices = @transform_2, window_bounds = array<i64: 1, 128>}, {pipeline_mode = #tpu.pipeline_mode<synchronous>, transform_indices = @transform_3, window_bounds = array<i64: 128, 128>}, {pipeline_mode = #tpu.pipeline_mode<synchronous>, transform_indices = @transform_4, window_bounds = array<i64: 1, 128>}, {pipeline_mode = #tpu.pipeline_mode<synchronous>, transform_indices = @transform_5, window_bounds = array<i64: 128, 128>}, {pipeline_mode = #tpu.pipeline_mode<synchronous>, transform_indices = @transform_6, window_bounds = array<i64: 1, 128>}, {transform_indices = @transform_7, window_bounds = array<i64: 8, 128>}]} {
    %c0 = arith.constant 0 : index
    %c0_0 = arith.constant 0 : index
    %0 = vector.load %arg1[%c0, %c0_0] : memref<8x128xf32, #tpu.memory_space<vmem>>, vector<8x128xf32>
    %c0_1 = arith.constant 0 : index
    %c0_2 = arith.constant 0 : index
    %1 = vector.load %arg2[%c0_1, %c0_2] : memref<128x128xbf16, #tpu.memory_space<vmem>>, vector<128x128xbf16>
    %c0_3 = arith.constant 0 : index
    %c0_4 = arith.constant 0 : index
    %2 = vector.load %arg3[%c0_3, %c0_4] : memref<1x128xf32, #tpu.memory_space<vmem>>, vector<1x128xf32>
    %3 = arith.truncf %0 : vector<8x128xf32> to vector<8x128xbf16>
    %cst = arith.constant dense<0.000000e+00> : vector<8x128xf32>
    %4 = tpu.matmul %3, %1, %cst {dimension_numbers = #tpu.dot_dimension_numbers<[1], [0], [0], [1], [0, 0, 1, 1], [], []>} : vector<8x128xbf16>, vector<128x128xbf16>, vector<8x128xf32> -> vector<8x128xf32>
    %5 = vector.broadcast %2 : vector<1x128xf32> to vector<8x128xf32>
    %6 = arith.addf %4, %5 : vector<8x128xf32>
    %cst_5 = arith.constant 0.000000e+00 : f32
    %7 = vector.broadcast %cst_5 : f32 to vector<8x128xf32>
    %8 = arith.maximumf %6, %7 : vector<8x128xf32>
    %c0_6 = arith.constant 0 : index
    %c0_7 = arith.constant 0 : index
    %9 = vector.load %arg4[%c0_6, %c0_7] : memref<128x128xbf16, #tpu.memory_space<vmem>>, vector<128x128xbf16>
    %c0_8 = arith.constant 0 : index
    %c0_9 = arith.constant 0 : index
    %10 = vector.load %arg5[%c0_8, %c0_9] : memref<1x128xf32, #tpu.memory_space<vmem>>, vector<1x128xf32>
    %11 = arith.truncf %8 : vector<8x128xf32> to vector<8x128xbf16>
    %cst_10 = arith.constant dense<0.000000e+00> : vector<8x128xf32>
    %12 = tpu.matmul %11, %9, %cst_10 {dimension_numbers = #tpu.dot_dimension_numbers<[1], [0], [0], [1], [0, 0, 1, 1], [], []>} : vector<8x128xbf16>, vector<128x128xbf16>, vector<8x128xf32> -> vector<8x128xf32>
    %13 = vector.broadcast %10 : vector<1x128xf32> to vector<8x128xf32>
    %14 = arith.addf %12, %13 : vector<8x128xf32>
    %cst_11 = arith.constant 0.000000e+00 : f32
    %15 = vector.broadcast %cst_11 : f32 to vector<8x128xf32>
    %16 = arith.maximumf %14, %15 : vector<8x128xf32>
    %c0_12 = arith.constant 0 : index
    %c0_13 = arith.constant 0 : index
    %17 = vector.load %arg6[%c0_12, %c0_13] : memref<128x128xbf16, #tpu.memory_space<vmem>>, vector<128x128xbf16>
    %c0_14 = arith.constant 0 : index
    %c0_15 = arith.constant 0 : index
    %18 = vector.load %arg7[%c0_14, %c0_15] : memref<1x128xf32, #tpu.memory_space<vmem>>, vector<1x128xf32>
    %19 = arith.truncf %16 : vector<8x128xf32> to vector<8x128xbf16>
    %cst_16 = arith.constant dense<0.000000e+00> : vector<8x128xf32>
    %20 = tpu.matmul %19, %17, %cst_16 {dimension_numbers = #tpu.dot_dimension_numbers<[1], [0], [0], [1], [0, 0, 1, 1], [], []>} : vector<8x128xbf16>, vector<128x128xbf16>, vector<8x128xf32> -> vector<8x128xf32>
    %21 = vector.broadcast %18 : vector<1x128xf32> to vector<8x128xf32>
    %22 = arith.addf %20, %21 : vector<8x128xf32>
    %c0_17 = arith.constant 0 : index
    %c0_18 = arith.constant 0 : index
    %23 = vector.load %arg8[%c0_17, %c0_18] : memref<8x128xf32, #tpu.memory_space<vmem>>, vector<8x128xf32>
    tpu.vector_store %arg8[%c0_17, %c0_18], %22 {strides = array<i32>} : memref<8x128xf32, #tpu.memory_space<vmem>>, vector<8x128xf32>,
    return
  }
  func.func @transform_0(%arg0: i32) -> (i32, i32) {
    %c0_i32 = arith.constant 0 : i32
    %c0_i32_0 = arith.constant 0 : i32
    return %arg0, %c0_i32 : i32, i32
  }
  func.func @transform_1(%arg0: i32) -> (i32, i32) {
    %c0_i32 = arith.constant 0 : i32
    %c0_i32_0 = arith.constant 0 : i32
    %c0_i32_1 = arith.constant 0 : i32
    return %c0_i32, %c0_i32_0 : i32, i32
  }
  func.func @transform_2(%arg0: i32) -> (i32, i32) {
    %c0_i32 = arith.constant 0 : i32
    %c0_i32_0 = arith.constant 0 : i32
    %c0_i32_1 = arith.constant 0 : i32
    return %c0_i32, %c0_i32_0 : i32, i32
  }
  func.func @transform_3(%arg0: i32) -> (i32, i32) {
    %c0_i32 = arith.constant 0 : i32
    %c0_i32_0 = arith.constant 0 : i32
    %c0_i32_1 = arith.constant 0 : i32
    return %c0_i32, %c0_i32_0 : i32, i32
  }
  func.func @transform_4(%arg0: i32) -> (i32, i32) {
    %c0_i32 = arith.constant 0 : i32
    %c0_i32_0 = arith.constant 0 : i32
    %c0_i32_1 = arith.constant 0 : i32
    return %c0_i32, %c0_i32_0 : i32, i32
  }
  func.func @transform_5(%arg0: i32) -> (i32, i32) {
    %c0_i32 = arith.constant 0 : i32
    %c0_i32_0 = arith.constant 0 : i32
    %c0_i32_1 = arith.constant 0 : i32
    return %c0_i32, %c0_i32_0 : i32, i32
  }
  func.func @transform_6(%arg0: i32) -> (i32, i32) {
    %c0_i32 = arith.constant 0 : i32
    %c0_i32_0 = arith.constant 0 : i32
    %c0_i32_1 = arith.constant 0 : i32
    return %c0_i32, %c0_i32_0 : i32, i32
  }
  func.func @transform_7(%arg0: i32) -> (i32, i32) {
    %c0_i32 = arith.constant 0 : i32
    %c0_i32_0 = arith.constant 0 : i32
    return %arg0, %c0_i32 : i32, i32
  }
}

</mosaic_0001>

<bundles_post_ra>
// kernel: feedforward_pallas.1
= control target key start
LH: loop header
LB: loop body
LE: loop exit
PB: predicated region body
PF: predicated region fallthrough
CT: control target
= control target key end

     0   :  { %v511_v0 = vmov 0.0   ;;  %vm512_vm0 = vmmov 0   ;;  %s670_s1 = inlined_call_operand.vmem [shape: bf16[128,128], index: 1, kind: input, shape index: {}]   ;;  %s671_s3 = inlined_call_operand.vmem [shape: bf16[128,128], index: 3, kind: input, shape index: {}]   ;;  %s672_s0 = inlined_call_operand.vmem [shape: f32[8,128], index: 0, kind: input, shape index: {}]   ;;  %s673_s5 = inlined_call_operand.vmem [shape: bf16[128,128], index: 5, kind: input, shape index: {}]   ;;  %s674_s2 = inlined_call_operand.vmem [shape: f32[1,128], index: 2, kind: input, shape index: {}]   ;;  %s675_s4 = inlined_call_operand.vmem [shape: f32[1,128], index: 4, kind: input, shape index: {}]   ;;  %s676_s6 = inlined_call_operand.vmem [shape: f32[1,128], index: 6, kind: input, shape index: {}]   ;;  %s677_s7 = inlined_call_operand.vmem [shape: f32[8,128], index: 7, kind: output, shape index: {}]  }
   0x1   :  { %425 = vmatprep.subr.bf16.mxu0 %v511_v0  ;;  %v487_v1 = vld [vmem:[%s670_s1] sm:$0xff]   ;;  %441 = vmatprep.mubr.msk.bf16.mxu0 %vm512_vm0, %v511_v0  ;;  %v488_v2 = vld [vmem:[%s670_s1 + $0x8] sm:$0xff]   ;;  %v489_v3 = vld [vmem:[%s670_s1 + $0x10] sm:$0xff]  }
   0x2   :  { %445 = vmatprep.subr.bf16.mxu1 %v511_v0  ;;  %461 = vmatprep.mubr.msk.bf16.mxu1 %vm512_vm0, %v511_v0  ;;  %v495_v4 = vld [vmem:[%s671_s3] sm:$0xff]   ;;  %v490_v5 = vld [vmem:[%s670_s1 + $0x18] sm:$0xff]   ;;  %v496_v6 = vld [vmem:[%s671_s3 + $0x8] sm:$0xff]  }
   0x3   :  { %426 = vmatpush3.bf16.msra.mxu0 %v487_v1  ;;  %446 = vmatpush3.bf16.msra.mxu1 %v495_v4  ;;  %v491_v7 = vld [vmem:[%s670_s1 + $0x20] sm:$0xff]   ;;  %v497_v8 = vld [vmem:[%s671_s3 + $0x10] sm:$0xff]   ;;  %v492_v9 = vld [vmem:[%s670_s1 + $0x28] sm:$0xff]  }
   0x4   :  { %427 = vmatprep.subr.bf16.mxu0 %v511_v0  ;;  %447 = vmatprep.subr.bf16.mxu1 %v511_v0  ;;  %v498_v10 = vld [vmem:[%s671_s3 + $0x18] sm:$0xff]   ;;  %v493_v11 = vld [vmem:[%s670_s1 + $0x30] sm:$0xff]   ;;  %v499_v12 = vld [vmem:[%s671_s3 + $0x20] sm:$0xff]  }
   0x5   :  { %v494_v13 = vld [vmem:[%s670_s1 + $0x38] sm:$0xff]   ;;  %v27_v14 = vld [vmem:[%s672_s0] sm:$0xff]  ;;  %v500_v15 = vld [vmem:[%s671_s3 + $0x28] sm:$0xff]  }
   0x6   :  { %v45_v16 = vpack.c.bf16 %v27_v14, %v27_v14  ;;  %v501_v17 = vld [vmem:[%s671_s3 + $0x30] sm:$0xff]   ;;  %v502_v18 = vld [vmem:[%s671_s3 + $0x38] sm:$0xff]   ;;  %v503_v19 = vld [vmem:[%s673_s5] sm:$0xff]  }
   0x7   :  { %428 = vmatpush3.bf16.msra.mxu0 %v488_v2  ;;  %448 = vmatpush3.bf16.msra.mxu1 %v496_v6  ;;  %v504_v20 = vld [vmem:[%s673_s5 + $0x8] sm:$0xff]   ;;  %v505_v21 = vld [vmem:[%s673_s5 + $0x10] sm:$0xff]   ;;  %v506_v22 = vld [vmem:[%s673_s5 + $0x18] sm:$0xff]  }
   0x8   :  { %429 = vmatprep.subr.bf16.mxu0 %v511_v0  ;;  %449 = vmatprep.subr.bf16.mxu1 %v511_v0  ;;  %v507_v23 = vld [vmem:[%s673_s5 + $0x20] sm:$0xff]   ;;  %v508_v24 = vld [vmem:[%s673_s5 + $0x28] sm:$0xff]   ;;  %v509_v33 = vld [vmem:[%s673_s5 + $0x30] sm:$0xff]  }
   0x9   :  { %v371_v25 = vld [vmem:[%s674_s2] ss:$0 sm:$0xff]  ;;  %v510_v34 = vld [vmem:[%s673_s5 + $0x38] sm:$0xff]  }
   0xa   :  { %v380_v35 = vld [vmem:[%s675_s4] ss:$0 sm:$0xff] }
   0xb   :  { %430 = vmatpush3.bf16.msra.mxu0 %v489_v3  ;;  %450 = vmatpush3.bf16.msra.mxu1 %v497_v8  ;;  %v389_v43 = vld [vmem:[%s676_s6] ss:$0 sm:$0xff] }
   0xc   :  { %431 = vmatprep.subr.bf16.mxu0 %v511_v0  ;;  %451 = vmatprep.subr.bf16.mxu1 %v511_v0 }
   0xf   :  { %432 = vmatpush3.bf16.msra.mxu0 %v490_v5  ;;  %452 = vmatpush3.bf16.msra.mxu1 %v498_v10 }
  0x10   :  { %433 = vmatprep.subr.bf16.mxu0 %v511_v0  ;;  %453 = vmatprep.subr.bf16.mxu1 %v511_v0 }
  0x13   :  { %434 = vmatpush3.bf16.msra.mxu0 %v491_v7  ;;  %454 = vmatpush3.bf16.msra.mxu1 %v499_v12 }
  0x14   :  { %435 = vmatprep.subr.bf16.mxu0 %v511_v0  ;;  %455 = vmatprep.subr.bf16.mxu1 %v511_v0 }
  0x17   :  { %436 = vmatpush3.bf16.msra.mxu0 %v492_v9  ;;  %456 = vmatpush3.bf16.msra.mxu1 %v500_v15 }
  0x18   :  { %437 = vmatprep.subr.bf16.mxu0 %v511_v0  ;;  %457 = vmatprep.subr.bf16.mxu1 %v511_v0 }
  0x1b   :  { %438 = vmatpush3.bf16.msra.mxu0 %v493_v11  ;;  %458 = vmatpush3.bf16.msra.mxu1 %v501_v17 }
  0x1c   :  { %439 = vmatprep.subr.bf16.mxu0 %v511_v0  ;;  %459 = vmatprep.subr.bf16.mxu1 %v511_v0 }
  0x1f   :  { %440 = vmatpush3.bf16.msra.mxu0 %v494_v13  ;;  %460 = vmatpush3.bf16.msra.mxu1 %v502_v18 }
  0x20   :  { %465 = vmatprep.subr.bf16.mxu0 %v511_v0 }
  0x22   :  { %442 = vmatmul.mubr.bf16.vlgmr.msra.gmra.mrb[0].mxu0 %v45_v16 }
  0x23   :  { %481 = vmatprep.mubr.msk.bf16.mxu0 %vm512_vm0, %v511_v0  ;;  %466 = vmatpush3.bf16.msra.mxu0 %v503_v19 }
  0x24   :  { %467 = vmatprep.subr.bf16.mxu0 %v511_v0 }
  0x27   :  { %468 = vmatpush3.bf16.msra.mxu0 %v504_v20 }
  0x28   :  { %469 = vmatprep.subr.bf16.mxu0 %v511_v0 }
  0x2b   :  { %470 = vmatpush3.bf16.msra.mxu0 %v505_v21 }
  0x2c   :  { %471 = vmatprep.subr.bf16.mxu0 %v511_v0 }
  0x2f   :  { %472 = vmatpush3.bf16.msra.mxu0 %v506_v22 }
  0x30   :  { %473 = vmatprep.subr.bf16.mxu0 %v511_v0 }
  0x33   :  { %474 = vmatpush3.bf16.msra.mxu0 %v507_v23 }
  0x34   :  { %475 = vmatprep.subr.bf16.mxu0 %v511_v0 }
  0x37   :  { %476 = vmatpush3.bf16.msra.mxu0 %v508_v24 }
  0x38   :  { %477 = vmatprep.subr.bf16.mxu0 %v511_v0 }
  0x3b   :  { %478 = vmatpush3.bf16.msra.mxu0 %v509_v33 }
  0x3c   :  { %479 = vmatprep.subr.bf16.mxu0 %v511_v0 }
  0x3f   :  { %480 = vmatpush3.bf16.msra.mxu0 %v510_v34 }
  0xf5   :  { %v134_v26 = vpop.f32.mrb[0].mxu0 }
  0xf6   :  { %v135_v27 = vadd.f32 %v371_v25, %v134_v26  ;;  %v443_v28 = vpop.f32.mrb[1].mxu0 }
  0xf7   :  { %v137_v29 = vpop.f32.mrb[2].mxu0 }
  0xf8   :  { %v140_v30 = vmax.f32 %v135_v27, 0.0  ;;  %v444_v31 = vpop.f32.mrb[3].mxu0 }
  0xfa   :  { %v158_v32 = vpack.c.bf16 %v140_v30, %v140_v30 }
  0xfc   :  { %462 = vmatmul.mubr.bf16.vlgmr.msra.gmra.mrb[0].mxu1 %v158_v32 }
 0x1cf   :  { %v247_v36 = vpop.f32.mrb[0].mxu1 }
 0x1d0   :  { %v248_v37 = vadd.f32 %v380_v35, %v247_v36  ;;  %v463_v38 = vpop.f32.mrb[1].mxu1 }
 0x1d1   :  { %v250_v39 = vpop.f32.mrb[2].mxu1 }
 0x1d2   :  { %v253_v40 = vmax.f32 %v248_v37, 0.0  ;;  %v464_v41 = vpop.f32.mrb[3].mxu1 }
 0x1d4   :  { %v271_v42 = vpack.c.bf16 %v253_v40, %v253_v40 }
 0x1d6   :  { %482 = vmatmul.mubr.bf16.vlgmr.msra.gmra.mrb[4].mxu0 %v271_v42 }
 0x2a9   :  { %v360_v44 = vpop.f32.mrb[4].mxu0 }
 0x2aa   :  { %v361_v45 = vadd.f32 %v389_v43, %v360_v44  ;;  %v483_v46 = vpop.f32.mrb[5].mxu0 }
 0x2ab   :  { %v363_v47 = vpop.f32.mrb[6].mxu0 }
 0x2ac   :  { %366 = vst [vmem:[%s677_s7] sm:$0xff] %v361_v45  ;;  %v484_v48 = vpop.f32.mrb[7].mxu0 }

</bundles_post_ra>
